<compile_context>
chip_gen: v7x
topology: tpu7x:2x2x1
jax: 0.10.0
libtpu: 0.0.40
codegen_flags: <defaults>
</compile_context>

<pallas_src>
import functools

import jax
import jax.numpy as jnp
from jax.experimental import pallas as pl
from jax.experimental.pallas import tpu as pltpu

_BN_EPS = 1e-5
_VMEM_LIMIT = 48 * 1024 * 1024  # leaves headroom under v7x's 64 MiB physical VMEM


def _round_up(v, m):
    return ((v + m - 1) // m) * m


def _pick_tile_hw(hw, channels, itemsize, budget_bytes=4 * 1024 * 1024):
    """Lane-dense (multiple-of-128) HW tile sized to a per-block VMEM budget."""
    per_lane_bytes = max(1, channels * itemsize)
    max_tile = max(128, (budget_bytes // per_lane_bytes) // 128 * 128)
    return max(128, min(max_tile, _round_up(hw, 128)))


def _pool_reduce_kernel(x_ref, pool_ref, *, hw, tile_hw, inv_hw):
    # x_ref:    (1, Cin, tile_hw)  one (batch, HW-tile) block, native dtype
    # pool_ref: (1, Cin, 1)        f32 accumulator, resident across the HW axis
    j = pl.program_id(1)

    @pl.when(j == 0)
    def _():
        pool_ref[...] = jnp.zeros_like(pool_ref)

    x = x_ref[...].astype(jnp.float32)  # accumulate in f32 even for bf16 inputs
    if hw % tile_hw != 0:
        # Mask the ragged boundary tile (OOB lanes of the block are undefined).
        pos = j * tile_hw + jax.lax.broadcasted_iota(jnp.int32, (1, 1, tile_hw), 2)
        x = jnp.where(pos < hw, x, 0.0)

    pool_ref[...] += jnp.sum(x, axis=-1, keepdims=True)

    @pl.when(j == pl.num_programs(1) - 1)
    def _():
        pool_ref[...] *= inv_hw


def _broadcast_kernel(y_ref, o_ref):
    # y_ref: (1, Cout, 1) post-conv/BN/ReLU values; o_ref: (1, Cout, tile_hw)
    o_ref[...] = jnp.broadcast_to(y_ref[...], o_ref.shape)


def aspp_pooling(x, conv_w, gamma, beta, running_mean, running_var):
    """x: (N, Cin, H, W) NCHW.  conv_w: (Cout, Cin, 1, 1).  Returns (N, Cout, H, W)."""
    n, c_in, h, w = x.shape
    c_out = conv_w.shape[0]
    hw = h * w
    out_dtype = x.dtype

    x_flat = x.reshape(n, c_in, hw)  # native dtype, native layout — no HBM shuffle

    # ---- Phase 1: tiled global average pool (Pallas, HBM-read bound) --------
    tile_in = _pick_tile_hw(hw, c_in, x.dtype.itemsize)
    grid_in = (n, pl.cdiv(hw, tile_in))
    pool = pl.pallas_call(
        functools.partial(
            _pool_reduce_kernel, hw=hw, tile_hw=tile_in, inv_hw=1.0 / hw
        ),
        out_shape=jax.ShapeDtypeStruct((n, c_in, 1), jnp.float32),
        grid=grid_in,
        in_specs=[pl.BlockSpec((1, c_in, tile_in), lambda i, j: (i, 0, j))],
        out_specs=pl.BlockSpec((1, c_in, 1), lambda i, j: (i, 0, 0)),
        compiler_params=pltpu.CompilerParams(
            dimension_semantics=("parallel", "arbitrary"),
            vmem_limit_bytes=_VMEM_LIMIT,
        ),
    )(x_flat)

    # ---- Phase 2: 1x1 conv with BatchNorm folded in + ReLU (tiny, plain JAX) -
    scale = gamma.astype(jnp.float32) / jnp.sqrt(
        running_var.astype(jnp.float32) + _BN_EPS
    )
    w2d = conv_w.reshape(c_out, c_in).astype(jnp.float32)
    w_folded = w2d * scale[:, None]                                   # (Cout, Cin)
    b_folded = beta.astype(jnp.float32) - running_mean.astype(jnp.float32) * scale
    y = jnp.maximum(pool[:, :, 0] @ w_folded.T + b_folded, 0.0)       # (N, Cout) f32
    y = y.astype(out_dtype)[:, :, None]                               # (N, Cout, 1)

    # ---- Phase 3: broadcast over H*W (Pallas, HBM-write bound) --------------
    tile_out = _pick_tile_hw(hw, c_out, jnp.dtype(out_dtype).itemsize)
    grid_out = (n, pl.cdiv(hw, tile_out))
    out_flat = pl.pallas_call(
        _broadcast_kernel,
        out_shape=jax.ShapeDtypeStruct((n, c_out, hw), out_dtype),
        grid=grid_out,
        in_specs=[pl.BlockSpec((1, c_out, 1), lambda i, j: (i, 0, 0))],
        out_specs=pl.BlockSpec((1, c_out, tile_out), lambda i, j: (i, 0, j)),
        compiler_params=pltpu.CompilerParams(
            dimension_semantics=("parallel", "parallel"),
            vmem_limit_bytes=_VMEM_LIMIT,
        ),
    )(y)

    return out_flat.reshape(n, c_out, h, w)


def _reference(x, conv_w, gamma, beta, running_mean, running_var):
    """Pure-JAX reference of the same forward pass (inference-mode BN)."""
    n, c_in, h, w = x.shape
    c_out = conv_w.shape[0]
    xf = x.astype(jnp.float32)
    pool = jnp.mean(xf, axis=(2, 3))                                  # (N, Cin)
    y = pool @ conv_w.reshape(c_out, c_in).astype(jnp.float32).T      # (N, Cout)
    y = (y - running_mean) / jnp.sqrt(running_var + _BN_EPS) * gamma + beta
    y = jnp.maximum(y, 0.0)
    return jnp.broadcast_to(y[:, :, None, None], (n, c_out, h, w)).astype(x.dtype)


if __name__ == "__main__":
    # Small shapes consistent with the module: N=2, Cin=4, H=W=16, Cout=8.
    N, C_IN, C_OUT, H, W = 2, 4, 8, 16, 16

    key = jax.random.PRNGKey(0)
    k_x, k_w = jax.random.split(key)

    x = jax.random.normal(k_x, (N, C_IN, H, W), dtype=jnp.float32)
    conv_w = jax.random.normal(k_w, (C_OUT, C_IN, 1, 1), dtype=jnp.float32) * 0.1

    # Deterministic, non-trivial BatchNorm parameters (inference / running stats).
    gamma = 1.0 + 0.1 * jnp.arange(C_OUT, dtype=jnp.float32)
    beta = 0.05 * jnp.arange(C_OUT, dtype=jnp.float32)
    running_mean = 0.01 * jnp.arange(C_OUT, dtype=jnp.float32)
    running_var = 1.0 + 0.02 * jnp.arange(C_OUT, dtype=jnp.float32)

    out = aspp_pooling(x, conv_w, gamma, beta, running_mean, running_var)
    out = jax.block_until_ready(out)

    ref = _reference(x, conv_w, gamma, beta, running_mean, running_var)
    assert out.shape == (N, C_OUT, H, W), out.shape
    assert out.dtype == x.dtype, out.dtype
    assert jnp.allclose(out, ref, atol=1e-5, rtol=1e-5), float(
        jnp.max(jnp.abs(out - ref))
    )

    # Extra check: ragged HW (hw < 128) exercises the boundary-tile masking path.
    x2 = jax.random.normal(jax.random.PRNGKey(1), (N, C_IN, 9, 9), dtype=jnp.float32)
    out2 = jax.block_until_ready(
        aspp_pooling(x2, conv_w, gamma, beta, running_mean, running_var)
    )
    ref2 = _reference(x2, conv_w, gamma, beta, running_mean, running_var)
    assert jnp.allclose(out2, ref2, atol=1e-5, rtol=1e-5), float(
        jnp.max(jnp.abs(out2 - ref2))
    )

    print("KERNEL_OK")
</pallas_src>

<mosaic_0001>
module attributes {stable_mosaic.version = 11 : i64} {
  func.func @_pool_reduce_kernel(%arg0: i32, %arg1: i32, %arg2: memref<1x4x256xf32, #tpu.memory_space<vmem>>, %arg3: memref<1x4x1xf32, #tpu.memory_space<vmem>>) attributes {dimension_semantics = [#tpu.dimension_semantics<parallel>, #tpu.dimension_semantics<arbitrary>], iteration_bounds = array<i64: 2, 1>, scalar_prefetch = 0 : i64, scratch_operands = 0 : i64, tpu.core_type = #tpu.core_type<tc>, window_params = [{transform_indices = @transform_0, window_bounds = array<i64: 1, 4, 256>}, {transform_indices = @transform_1, window_bounds = array<i64: 1, 4, 1>}]} {
    %c0_i32 = arith.constant 0 : i32
    %0 = arith.cmpi eq, %arg1, %c0_i32 : i32
    %1 = arith.extui %0 : i1 to i32
    %c0_i32_0 = arith.constant 0 : i32
    %2 = arith.cmpi ne, %1, %c0_i32_0 : i32
    scf.if %2 {
      %cst_11 = arith.constant 0.000000e+00 : f32
      %12 = vector.broadcast %cst_11 : f32 to vector<1x4x1xf32>
      %c0_12 = arith.constant 0 : index
      %c0_13 = arith.constant 0 : index
      %c0_14 = arith.constant 0 : index
      %13 = vector.load %arg3[%c0_12, %c0_13, %c0_14] : memref<1x4x1xf32, #tpu.memory_space<vmem>>, vector<1x4x1xf32>
      tpu.vector_store %arg3[%c0_12, %c0_13, %c0_14], %12 {strides = array<i32>} : memref<1x4x1xf32, #tpu.memory_space<vmem>>, vector<1x4x1xf32>,
    } else {
    }
    %c0 = arith.constant 0 : index
    %c0_1 = arith.constant 0 : index
    %c0_2 = arith.constant 0 : index
    %3 = vector.load %arg2[%c0, %c0_1, %c0_2] : memref<1x4x256xf32, #tpu.memory_space<vmem>>, vector<1x4x256xf32>
    %c0_3 = arith.constant 0 : index
    %c0_4 = arith.constant 0 : index
    %c0_5 = arith.constant 0 : index
    %4 = vector.load %arg3[%c0_3, %c0_4, %c0_5] : memref<1x4x1xf32, #tpu.memory_space<vmem>>, vector<1x4x1xf32>
    %cst = arith.constant dense<0.000000e+00> : vector<1x4xf32>
    %5 = vector.multi_reduction <add>, %3, %cst [2] : vector<1x4x256xf32> to vector<1x4xf32>
    %6 = vector.shape_cast %5 : vector<1x4xf32> to vector<1x4x1xf32>
    %7 = arith.addf %4, %6 : vector<1x4x1xf32>
    %c0_6 = arith.constant 0 : index
    %c0_7 = arith.constant 0 : index
    %c0_8 = arith.constant 0 : index
    %8 = vector.load %arg3[%c0_6, %c0_7, %c0_8] : memref<1x4x1xf32, #tpu.memory_space<vmem>>, vector<1x4x1xf32>
    tpu.vector_store %arg3[%c0_6, %c0_7, %c0_8], %7 {strides = array<i32>} : memref<1x4x1xf32, #tpu.memory_space<vmem>>, vector<1x4x1xf32>,
    %c0_i32_9 = arith.constant 0 : i32
    %9 = arith.cmpi eq, %arg1, %c0_i32_9 : i32
    %10 = arith.extui %9 : i1 to i32
    %c0_i32_10 = arith.constant 0 : i32
    %11 = arith.cmpi ne, %10, %c0_i32_10 : i32
    scf.if %11 {
      %c0_11 = arith.constant 0 : index
      %c0_12 = arith.constant 0 : index
      %c0_13 = arith.constant 0 : index
      %12 = vector.load %arg3[%c0_11, %c0_12, %c0_13] : memref<1x4x1xf32, #tpu.memory_space<vmem>>, vector<1x4x1xf32>
      %cst_14 = arith.constant 3.906250e-03 : f32
      %13 = vector.broadcast %cst_14 : f32 to vector<1x4x1xf32>
      %14 = arith.mulf %12, %13 : vector<1x4x1xf32>
      %c0_15 = arith.constant 0 : index
      %c0_16 = arith.constant 0 : index
      %c0_17 = arith.constant 0 : index
      %15 = vector.load %arg3[%c0_15, %c0_16, %c0_17] : memref<1x4x1xf32, #tpu.memory_space<vmem>>, vector<1x4x1xf32>
      tpu.vector_store %arg3[%c0_15, %c0_16, %c0_17], %14 {strides = array<i32>} : memref<1x4x1xf32, #tpu.memory_space<vmem>>, vector<1x4x1xf32>,
    } else {
    }
    return
  }
  func.func @transform_0(%arg0: i32, %arg1: i32) -> (i32, i32, i32) {
    %c0_i32 = arith.constant 0 : i32
    %c0_i32_0 = arith.constant 0 : i32
    return %arg0, %c0_i32, %arg1 : i32, i32, i32
  }
  func.func @transform_1(%arg0: i32, %arg1: i32) -> (i32, i32, i32) {
    %c0_i32 = arith.constant 0 : i32
    %c0_i32_0 = arith.constant 0 : i32
    %c0_i32_1 = arith.constant 0 : i32
    return %arg0, %c0_i32, %c0_i32_0 : i32, i32, i32
  }
}

</mosaic_0001>

<bundles_post_ra>
// kernel: tpu_custom_call.1
= control target key start
LH: loop header
LB: loop body
LE: loop exit
PB: predicated region body
PF: predicated region fallthrough
CT: control target
= control target key end

     0   :  { %6 = vsyncpa [#allocation3], 0  ;;  %s544_s0 = inlined_call_operand.hbm [shape: f32[2,4,256], index: 0, kind: input, shape index: {}]   ;;  %s545_s1 = inlined_call_operand.vmem [shape: f32[2,4,1], index: 1, kind: output, shape index: {}]  }
   0x1   :  { %8 = vsyncpa [#allocation3 + $0x1], 0  ;;  %s416_s6 = smov 0   ;;  %s418_s7 = smov 0  }
   0x2   :  { %s420_s8 = smov 0   ;;  %s422_s9 = smov 0  }
   0x3   :  { %s424_s10 = smov 0   ;;  %s426_s11 = smov 0  }
   0x4 LB: > { %s252_s12 = sadd.s32 4294967295, %s402_s11   ;;  %s26_s13 = sadd.s32 1, %s398_s10  ;;  %s402_s11 = sphi %s426_s11, %s14_s11   ;;  %s398_s10 = sphi %s424_s10, %s555_s10   ;;  %s394_s9 = sphi %s422_s9, %s554_s9   ;;  %s390_s8 = sphi %s420_s8, %s553_s8   ;;  %s386_s7 = sphi %s418_s7, %s552_s7   ;;  %s382_s6 = sphi %s416_s6, %s551_s6  }
   0x5   : > { %p28_p0 = scmp.ge.s32.totalorder %s26_s13, 2  ;;  %s35_s14 = sadd.s32 1, %s390_s8 }
   0x6   : > { %p42_p1 = scmp.ne.s32.totalorder %s390_s8, %s386_s7  ;;  %p43_p2 = scmp.eq.s32.totalorder %s402_s11, 0 }
   0x7   : > { %s557_s13 = smov (%p28_p0, %s26_s13), 0  ;;  %p48_p4 = scmp.ne.s32.totalorder %s386_s7, %s382_s6 }
   0x8   : > { %p452_p3 = por %p43_p2, %p42_p1  ;;  %s30_s16 = ssub.s32 %s398_s10, %s557_s13 }
   0x9   : > { %p49_p5 = scmp.eq.s32.totalorder %s252_s12, 0  ;;  %p33_p6 = scmp.eq.s32.totalorder %s30_s16, 0 }
   0xa   : > { %p271_p8 = scmp.lt.s32.totalorder %s402_s11, 2  ;;  %s98_s19 = sand.u32 1, %s390_s8  }
   0xb   : > { %p459_p7 = por %p49_p5, %p48_p4  ;;  %s264_s20 = sshll.u32 %s398_s10, 7 }
   0xc   : > { %s465_s18 = scalar_select %p33_p6, %s390_s8, %s35_s14  }
   0xd   : > { %s256_s21 = sshll.u32 %s98_s19, 3  ;;  %s472_s24 = scalar_lea.hbm %s544_s0, %s264_s20 }
   0xe   : > { %s102_s25 = scalar_lea.vmem [#allocation2], %s256_s21  ;;  %p476_p9 = pnand %p271_p8, %p452_p3 }
   0xf   : > { %s112_s26 = sshll.u32 %s102_s25, 4  ;;  %s99_s28 = scalar_lea.sflag [#allocation3], %s98_s19  ;;  %s480_s26 = int_to_ptr.vmem [resolvable:$true] %s112_s26 }
  0x10   : > { %s322_s29 = scalar_lea.hbm %s472_s24, 128  ;;  %p324_p13 = pneg %p476_p9 }
  0x11   : > { %p323_p12 = scmp.ne.s32.totalorder %s472_s24, %s322_s29  ;;  %s327_s3 = scalar_lea.hbm %s544_s0, 256 }
  0x12   : > { %p328_p2 = scmp.lt.u32.totalorder %s472_s24, %s544_s0  ;;  %p329_p3 = scmp.lt.u32.totalorder %s327_s3, %s322_s29 }
  0x13   : > { %p325_p0 = pnand %p324_p13, %p323_p12  ;;  %p331_p5 = scmp.lt.u32.totalorder %s322_s29, %s472_s24 }
  0x14   : > { %p330_p4 = por %p329_p3, %p328_p2 }
  0x15   : > { %p326_p1 = pneg %p325_p0 }
  0x16   : > { %p332_p6 = por %p331_p5, %p330_p4 }
  0x18   : > { %p333_p8 = pnand %p332_p6, %p326_p1 }
  0x1a   : > { %336 = shalt.err (!%p333_p8)
}
  0x1b   : > { %s337_s6 = scalar_lea.vmem %s480_s26, 128  ;;  %s404_s12 = smov [#allocation2]  }
  0x1c   : > { %p338_p12 = scmp.ne.s32.totalorder %s480_s26, %s337_s6  ;;  %s342_s14 = sshll.u32 %s404_s12, 4  ;;  %s343_s14 = int_to_ptr.vmem [resolvable:$false] %s342_s14 }
  0x1d   : > { %s344_s15 = scalar_lea.vmem %s343_s14, 256  ;;  %p345_p11 = scmp.lt.s32.totalorder %s480_s26, %s343_s14 }
  0x1e   : > { %p340_p0 = pnand %p338_p12, %p324_p13  ;;  %p346_p2 = scmp.lt.s32.totalorder %s344_s15, %s337_s6 }
  0x20   : > { %p341_p10 = pneg %p340_p0  ;;  %p347_p3 = por %p346_p2, %p345_p11 }
  0x22   : > { %p348_p4 = pnand %p347_p3, %p341_p10 }
  0x24   : > { %351 = shalt.err (!%p348_p4)
}
  0x25   : > { %270 = dma.hbm_to_vmem [thread:$0]  (!%p476_p9), %s472_s24, 128, %s480_s26, %s99_s28  }
  0x26   : > { %p549_p1 = scmp.lt.s32.totalorder %s402_s11, 3  ;;  %p550_p5 = scmp.ge.s32.totalorder %s402_s11, 1 }
  0x28   : > { %p118_p13 = pnand %p550_p5, %p549_p1 }
  0x29   : > { %s123_s16 = sand.u32 (!%p118_p13), 1, %s386_s7  }
  0x2a   : > { %121 = sbr.rel (%p118_p13) target bundleno = 211 (0xd3), region = 24  ;;  %s260_s19 = sshll.u32 (!%p118_p13), %s123_s16, 3 }
  0x2b   : > { %s124_s20 = scalar_lea.sflag (!%p118_p13), [#allocation3], %s123_s16  ;;  %s127_s21 = scalar_lea.vmem (!%p118_p13), [#allocation2], %s260_s19 }
  0x31   : > { %377 = dma.done.wait (%p459_p7), %s124_s20, 128  }
  0x32   : > { %379 = vsyncadd (%p459_p7), %s124_s20, 4294967168  ;;  %p146_p10 = scmp.lt.s32.totalorder %s394_s9, 1  ;;  %vm154_vm0 = vcmask 3072   ;;  %vm161_vm1 = vcmask 1043456   ;;  %v405_v0 = vmov 0.0   ;;  %v156_v1 = vld [vmem:[%s127_s21] sm:$0xff] }
  0x33   : > { %v159_v2 = vcombine.high %v156_v1, %v156_v1  ;;  %v162_v3 = vsel %vm161_vm1, %v156_v1, 0.0 }
  0x34   : > { %s559_s9 = smov (!%p146_p10, %s394_s9), 1 }
  0x35   : > { %s261_s22 = sshll.u32 %s559_s9, 2  ;;  %v163_v4 = vsel %vm161_vm1, %v159_v2, 0.0 }
  0x36   : > { %s149_s25 = scalar_lea.vmem %s545_s1, %s261_s22  ;;  %v164_v5 = vadd.f32 %v163_v4, %v162_v3 }
  0x37   : > { %155 = vst.msk [vmem:[%s149_s25] sm:$0xf] %vm154_vm0, %v405_v0 }
  0x38   : > { %165 = vadd.xlane.f32.xlu0 %v164_v5 }
  0x3e   : > { %v157_v6 = vld [vmem:[%s149_s25] sm:$0xf] }
  0xc5   : > { %v166_v7 = vpop.xlane.xlu0 %165 }
  0xc6   : > { %v167_v8 = vadd.f32 %v166_v7, %v157_v6 }
  0xc8   : > { %169 = vst.msk [vmem:[%s149_s25] sm:$0xf] %vm154_vm0, %v167_v8 }
  0xcf   : > { %v173_v9 = vld [vmem:[%s149_s25] sm:$0xf] }
  0xd0   : > { %v174_v10 = vmul.f32 0.00390625, %v173_v9 }
  0xd2   : > { %175 = vst.msk [vmem:[%s149_s25] sm:$0xf] %vm154_vm0, %v174_v10 }
  0xd3 PF: > { %s14_s11 = sadd.s32 1, %s402_s11   ;;  %s551_s6 = smov %s386_s7 }
  0xd4   : > { %p11_p7 = scmp.ge.s32.totalorder %s14_s11, 4   ;;  %s552_s7 = smov %s390_s8 }
  0xd5   : > { %s553_s8 = smov %s465_s18  ;;  %s554_s9 = smov %s398_s10 }
  0xd6   : > { %s555_s10 = smov %s557_s13  ;;  %13 = sbr.rel (!%p11_p7) target bundleno = 4 (0x4), region = 72 }
  0xdd   :  { %195 = vsyncpa [#allocation3], 1 }
  0xde   :  { %197 = vsyncpa [#allocation3 + $0x1], 1 }

</bundles_post_ra>
